<compile_context>
chip_gen: v7x
topology: tpu7x:2x2x1
jax: 0.10.0
libtpu: 0.0.40
codegen_flags: <defaults>
</compile_context>

<pallas_src>
import functools

import jax
import jax.numpy as jnp
from jax.experimental import pallas as pl
from jax.experimental.pallas import tpu as pltpu


# --------------------------------------------------------------------------
# Fused GCN layer kernel: out = act(A_hat @ (X @ W) + b), K-tiled over nodes.
# --------------------------------------------------------------------------
def _gcn_layer_kernel(a_ref, x_ref, w_ref, b_ref, o_ref, acc_ref, *, apply_relu):
    # a_ref:   (tm, tk)     bf16  A_hat tile
    # x_ref:   (tk, F_in)   bf16  node-feature slab for this K tile
    # w_ref:   (F_in, F_out) bf16 (same block every step -> resident)
    # b_ref:   (1, F_out)   f32
    # o_ref:   (tm, F_out)
    # acc_ref: (tm, F_out)  f32 VMEM scratch accumulator
    k = pl.program_id(1)

    @pl.when(k == 0)
    def _():
        acc_ref[...] = jnp.zeros_like(acc_ref)

    # Feature transform for this node slab (tiny contraction; recomputed per
    # row tile, negligible FLOPs vs. the N^2 aggregation).
    xw = jnp.dot(x_ref[...], w_ref[...], preferred_element_type=jnp.float32)
    # Aggregation: accumulate A_hat[i, k] @ (X[k] @ W) in f32.
    acc_ref[...] += jnp.dot(a_ref[...], xw.astype(a_ref.dtype),
                            preferred_element_type=jnp.float32)

    @pl.when(k == pl.num_programs(1) - 1)
    def _():
        out = acc_ref[...] + b_ref[...]          # (1, F_out) broadcasts over rows
        if apply_relu:
            out = jnp.maximum(out, 0.0)
        o_ref[...] = out.astype(o_ref.dtype)


def _fused_gcn_layer(a_hat, x, w, b, *, relu, tm, tk, out_dtype):
    """One GCNConv layer as a single pallas_call.

    a_hat: (N_pad, N_pad) bf16, x: (N_pad, F_in) bf16, w: (F_in, F_out) bf16,
    b: (1, F_out) f32.  Requires tm | N_pad and tk | N_pad.
    """
    n_pad = a_hat.shape[0]
    f_in, f_out = w.shape
    grid = (n_pad // tm, n_pad // tk)

    kernel = functools.partial(_gcn_layer_kernel, apply_relu=relu)

    return pl.pallas_call(
        kernel,
        out_shape=jax.ShapeDtypeStruct((n_pad, f_out), out_dtype),
        grid_spec=pltpu.PrefetchScalarGridSpec(
            num_scalar_prefetch=0,
            grid=grid,
            in_specs=[
                pl.BlockSpec((tm, tk), lambda i, k: (i, k)),        # A_hat tile
                pl.BlockSpec((tk, f_in), lambda i, k: (k, 0)),      # X node slab
                pl.BlockSpec((f_in, f_out), lambda i, k: (0, 0)),   # W (resident)
                pl.BlockSpec((1, f_out), lambda i, k: (0, 0)),      # bias row
            ],
            out_specs=pl.BlockSpec((tm, f_out), lambda i, k: (i, 0)),
            scratch_shapes=[pltpu.VMEM((tm, f_out), jnp.float32)],
        ),
        compiler_params=pltpu.CompilerParams(
            dimension_semantics=("parallel", "arbitrary")),
    )(a_hat, x, w, b)


# --------------------------------------------------------------------------
# Tiling / padding helpers
# --------------------------------------------------------------------------
def _round_up(x, m):
    return ((x + m - 1) // m) * m


def _pick_tiles(num_nodes, tm_cap=256, tk_cap=512):
    """Return (tm, tk, n_pad) with tm | n_pad and tk | n_pad.

    tm: sublane-aligned row tile; split into >= 2 tiles whenever possible so
        the "parallel" axis shards across TensorCores (v7x megacore).
    tk: the whole (padded) node count when it fits, else a 128-aligned cap so
        the aggregation contraction is K-tiled and VMEM stays bounded.
    """
    assert tm_cap % 8 == 0 and tk_cap % 128 == 0 and tk_cap % tm_cap == 0
    n = num_nodes
    if n <= tk_cap:
        if n <= 8:
            return n, n, n                      # single full-block grid step
        tm = min(tm_cap, _round_up(-(-n // 2), 8))   # >= 2 row tiles
        n_pad = _round_up(n, tm)
        return tm, n_pad, n_pad                 # contraction kept whole
    n_pad = _round_up(n, tk_cap)                 # zero-pad: no garbage K tails
    return tm_cap, tk_cap, n_pad


# --------------------------------------------------------------------------
# Normalized adjacency (PyG gcn_norm semantics)
# --------------------------------------------------------------------------
def _normalized_adjacency(edge_index, num_nodes):
    """Dense D^-1/2 (A + I) D^-1/2 matching PyG GCNConv's gcn_norm.

    add_remaining_self_loops semantics: every node ends up with exactly ONE
    self-loop of weight 1, even if edge_index already contains self-loops.
    """
    # TODO(synk): the edge_index -> dense-adjacency scatter stays in plain JAX;
    # for large sparse graphs this should become a CSR SpMM Pallas kernel
    # (scalar-prefetched row pointers / column indices) instead of dense N^2.
    src, dst = edge_index[0], edge_index[1]
    off_diag = jnp.where(src == dst, 0.0, 1.0).astype(jnp.float32)
    a = jnp.zeros((num_nodes, num_nodes), dtype=jnp.float32)
    a = a.at[dst, src].add(off_diag)                   # message flows src -> dst
    a = a + jnp.eye(num_nodes, dtype=jnp.float32)      # exactly one self-loop/node
    deg = jnp.sum(a, axis=1)                           # in-degree incl. self-loop
    d_inv_sqrt = jnp.where(deg > 0.0, jax.lax.rsqrt(deg), 0.0)
    return a * d_inv_sqrt[:, None] * d_inv_sqrt[None, :]


# --------------------------------------------------------------------------
# GCNFeat forward
# --------------------------------------------------------------------------
@jax.jit
def gcn_feat_forward(x, edge_index, w1, b1, w2, b2):
    """JAX/Pallas equivalent of GCNFeat.forward(x, edge_index)."""
    n = x.shape[0]
    compute_dtype = jnp.bfloat16       # MXU-native operands; f32 accumulation

    tm, tk, n_pad = _pick_tiles(n)

    a_hat = _normalized_adjacency(edge_index, n).astype(compute_dtype)
    a_pad = jnp.zeros((n_pad, n_pad), compute_dtype).at[:n, :n].set(a_hat)
    x_pad = jnp.zeros((n_pad, x.shape[1]), compute_dtype).at[:n, :].set(
        x.astype(compute_dtype))

    # Layer 1: relu(A_hat @ (x @ W1) + b1); intermediate kept in bf16 so the
    # layer-2 aggregation re-reads half the bytes.  (Padded rows of h are
    # relu(b1) != 0, but the padded A_hat columns are zero so they contribute
    # nothing in layer 2.)
    h = _fused_gcn_layer(
        a_pad, x_pad, w1.astype(compute_dtype),
        b1.reshape(1, -1).astype(jnp.float32),
        relu=True, tm=tm, tk=tk, out_dtype=compute_dtype)

    # Layer 2: A_hat @ (h @ W2) + b2, f32 output.
    out = _fused_gcn_layer(
        a_pad, h, w2.astype(compute_dtype),
        b2.reshape(1, -1).astype(jnp.float32),
        relu=False, tm=tm, tk=tk, out_dtype=x.dtype)

    return out[:n]


# --------------------------------------------------------------------------
# Pure-JAX f32 reference for verification
# --------------------------------------------------------------------------
def _reference(x, edge_index, w1, b1, w2, b2):
    a_hat = _normalized_adjacency(edge_index, x.shape[0])
    h = jnp.maximum(a_hat @ (x @ w1) + b1[None, :], 0.0)
    return a_hat @ (h @ w2) + b2[None, :]


if __name__ == "__main__":
    key = jax.random.PRNGKey(0)
    num_nodes, in_dim, hidden_dim, out_dim = 16, 8, 32, 16
    num_edges = 40

    k_x, k_e, k_w1, k_b1, k_w2, k_b2 = jax.random.split(key, 6)
    x = jax.random.normal(k_x, (num_nodes, in_dim), dtype=jnp.float32)
    edge_index = jax.random.randint(
        k_e, (2, num_edges), 0, num_nodes, dtype=jnp.int32)

    bound1 = 1.0 / (in_dim ** 0.5)
    w1 = jax.random.uniform(k_w1, (in_dim, hidden_dim),
                            minval=-bound1, maxval=bound1, dtype=jnp.float32)
    b1 = jax.random.uniform(k_b1, (hidden_dim,),
                            minval=-bound1, maxval=bound1, dtype=jnp.float32)
    bound2 = 1.0 / (hidden_dim ** 0.5)
    w2 = jax.random.uniform(k_w2, (hidden_dim, out_dim),
                            minval=-bound2, maxval=bound2, dtype=jnp.float32)
    b2 = jax.random.uniform(k_b2, (out_dim,),
                            minval=-bound2, maxval=bound2, dtype=jnp.float32)

    out = gcn_feat_forward(x, edge_index, w1, b1, w2, b2)
    out = jax.block_until_ready(out)

    ref = _reference(x, edge_index, w1, b1, w2, b2)
    assert out.shape == (num_nodes, out_dim), out.shape
    # bf16 operands (f32 accumulation) vs. an f32 reference -> loose tolerance.
    max_err = float(jnp.max(jnp.abs(out - ref)))
    assert jnp.allclose(out, ref, atol=5e-2, rtol=5e-2), max_err

    print("KERNEL_OK")
</pallas_src>

<mosaic_0001>
module attributes {stable_mosaic.version = 11 : i64} {
  func.func @_gcn_layer_kernel(%arg0: i32, %arg1: i32, %arg2: memref<8x16xbf16, #tpu.memory_space<vmem>>, %arg3: memref<16x8xbf16, #tpu.memory_space<vmem>>, %arg4: memref<8x32xbf16, #tpu.memory_space<vmem>>, %arg5: memref<1x32xf32, #tpu.memory_space<vmem>>, %arg6: memref<8x32xbf16, #tpu.memory_space<vmem>>, %arg7: memref<8x32xf32, #tpu.memory_space<vmem>>) attributes {dimension_semantics = [#tpu.dimension_semantics<parallel>, #tpu.dimension_semantics<arbitrary>], iteration_bounds = array<i64: 2, 1>, scalar_prefetch = 0 : i64, scratch_operands = 1 : i64, tpu.core_type = #tpu.core_type<tc>, window_params = [{transform_indices = @transform_0, window_bounds = array<i64: 8, 16>}, {transform_indices = @transform_1, window_bounds = array<i64: 16, 8>}, {pipeline_mode = #tpu.pipeline_mode<synchronous>, transform_indices = @transform_2, window_bounds = array<i64: 8, 32>}, {pipeline_mode = #tpu.pipeline_mode<synchronous>, transform_indices = @transform_3, window_bounds = array<i64: 1, 32>}, {transform_indices = @transform_4, window_bounds = array<i64: 8, 32>}]} {
    %c0_i32 = arith.constant 0 : i32
    %0 = arith.cmpi eq, %arg1, %c0_i32 : i32
    %1 = arith.extui %0 : i1 to i32
    %c0_i32_0 = arith.constant 0 : i32
    %2 = arith.cmpi ne, %1, %c0_i32_0 : i32
    scf.if %2 {
      %cst_13 = arith.constant 0.000000e+00 : f32
      %15 = vector.broadcast %cst_13 : f32 to vector<8x32xf32>
      %c0_14 = arith.constant 0 : index
      %c0_15 = arith.constant 0 : index
      %16 = vector.load %arg7[%c0_14, %c0_15] : memref<8x32xf32, #tpu.memory_space<vmem>>, vector<8x32xf32>
      tpu.vector_store %arg7[%c0_14, %c0_15], %15 {strides = array<i32>} : memref<8x32xf32, #tpu.memory_space<vmem>>, vector<8x32xf32>,
    } else {
    }
    %c0 = arith.constant 0 : index
    %c0_1 = arith.constant 0 : index
    %3 = vector.load %arg3[%c0, %c0_1] : memref<16x8xbf16, #tpu.memory_space<vmem>>, vector<16x8xbf16>
    %c0_2 = arith.constant 0 : index
    %c0_3 = arith.constant 0 : index
    %4 = vector.load %arg4[%c0_2, %c0_3] : memref<8x32xbf16, #tpu.memory_space<vmem>>, vector<8x32xbf16>
    %cst = arith.constant dense<0.000000e+00> : vector<16x32xf32>
    %5 = tpu.matmul %3, %4, %cst {dimension_numbers = #tpu.dot_dimension_numbers<[1], [0], [0], [1], [0, 0, 1, 1], [], []>} : vector<16x8xbf16>, vector<8x32xbf16>, vector<16x32xf32> -> vector<16x32xf32>
    %c0_4 = arith.constant 0 : index
    %c0_5 = arith.constant 0 : index
    %6 = vector.load %arg7[%c0_4, %c0_5] : memref<8x32xf32, #tpu.memory_space<vmem>>, vector<8x32xf32>
    %c0_6 = arith.constant 0 : index
    %c0_7 = arith.constant 0 : index
    %7 = vector.load %arg2[%c0_6, %c0_7] : memref<8x16xbf16, #tpu.memory_space<vmem>>, vector<8x16xbf16>
    %8 = arith.truncf %5 : vector<16x32xf32> to vector<16x32xbf16>
    %cst_8 = arith.constant dense<0.000000e+00> : vector<8x32xf32>
    %9 = tpu.matmul %7, %8, %cst_8 {dimension_numbers = #tpu.dot_dimension_numbers<[1], [0], [0], [1], [0, 0, 1, 1], [], []>} : vector<8x16xbf16>, vector<16x32xbf16>, vector<8x32xf32> -> vector<8x32xf32>
    %10 = arith.addf %6, %9 : vector<8x32xf32>
    %c0_9 = arith.constant 0 : index
    %c0_10 = arith.constant 0 : index
    %11 = vector.load %arg7[%c0_9, %c0_10] : memref<8x32xf32, #tpu.memory_space<vmem>>, vector<8x32xf32>
    tpu.vector_store %arg7[%c0_9, %c0_10], %10 {strides = array<i32>} : memref<8x32xf32, #tpu.memory_space<vmem>>, vector<8x32xf32>,
    %c0_i32_11 = arith.constant 0 : i32
    %12 = arith.cmpi eq, %arg1, %c0_i32_11 : i32
    %13 = arith.extui %12 : i1 to i32
    %c0_i32_12 = arith.constant 0 : i32
    %14 = arith.cmpi ne, %13, %c0_i32_12 : i32
    scf.if %14 {
      %c0_13 = arith.constant 0 : index
      %c0_14 = arith.constant 0 : index
      %15 = vector.load %arg7[%c0_13, %c0_14] : memref<8x32xf32, #tpu.memory_space<vmem>>, vector<8x32xf32>
      %c0_15 = arith.constant 0 : index
      %c0_16 = arith.constant 0 : index
      %16 = vector.load %arg5[%c0_15, %c0_16] : memref<1x32xf32, #tpu.memory_space<vmem>>, vector<1x32xf32>
      %17 = vector.broadcast %16 : vector<1x32xf32> to vector<8x32xf32>
      %18 = arith.addf %15, %17 : vector<8x32xf32>
      %cst_17 = arith.constant 0.000000e+00 : f32
      %19 = vector.broadcast %cst_17 : f32 to vector<8x32xf32>
      %20 = arith.maximumf %18, %19 : vector<8x32xf32>
      %21 = arith.truncf %20 : vector<8x32xf32> to vector<8x32xbf16>
      %c0_18 = arith.constant 0 : index
      %c0_19 = arith.constant 0 : index
      %22 = vector.load %arg6[%c0_18, %c0_19] : memref<8x32xbf16, #tpu.memory_space<vmem>>, vector<8x32xbf16>
      tpu.vector_store %arg6[%c0_18, %c0_19], %21 {strides = array<i32>} : memref<8x32xbf16, #tpu.memory_space<vmem>>, vector<8x32xbf16>,
    } else {
    }
    return
  }
  func.func @transform_0(%arg0: i32, %arg1: i32) -> (i32, i32) {
    %c0_i32 = arith.constant 0 : i32
    return %arg0, %arg1 : i32, i32
  }
  func.func @transform_1(%arg0: i32, %arg1: i32) -> (i32, i32) {
    %c0_i32 = arith.constant 0 : i32
    %c0_i32_0 = arith.constant 0 : i32
    return %arg1, %c0_i32 : i32, i32
  }
  func.func @transform_2(%arg0: i32, %arg1: i32) -> (i32, i32) {
    %c0_i32 = arith.constant 0 : i32
    %c0_i32_0 = arith.constant 0 : i32
    %c0_i32_1 = arith.constant 0 : i32
    return %c0_i32, %c0_i32_0 : i32, i32
  }
  func.func @transform_3(%arg0: i32, %arg1: i32) -> (i32, i32) {
    %c0_i32 = arith.constant 0 : i32
    %c0_i32_0 = arith.constant 0 : i32
    %c0_i32_1 = arith.constant 0 : i32
    return %c0_i32, %c0_i32_0 : i32, i32
  }
  func.func @transform_4(%arg0: i32, %arg1: i32) -> (i32, i32) {
    %c0_i32 = arith.constant 0 : i32
    %c0_i32_0 = arith.constant 0 : i32
    return %arg0, %c0_i32 : i32, i32
  }
}

module attributes {stable_mosaic.version = 11 : i64} {
  func.func @_gcn_layer_kernel(%arg0: i32, %arg1: i32, %arg2: memref<8x16xbf16, #tpu.memory_space<vmem>>, %arg3: memref<16x32xbf16, #tpu.memory_space<vmem>>, %arg4: memref<32x16xbf16, #tpu.memory_space<vmem>>, %arg5: memref<1x16xf32, #tpu.memory_space<vmem>>, %arg6: memref<8x16xf32, #tpu.memory_space<vmem>>, %arg7: memref<8x16xf32, #tpu.memory_space<vmem>>) attributes {dimension_semantics = [#tpu.dimension_semantics<parallel>, #tpu.dimension_semantics<arbitrary>], iteration_bounds = array<i64: 2, 1>, scalar_prefetch = 0 : i64, scratch_operands = 1 : i64, tpu.core_type = #tpu.core_type<tc>, window_params = [{transform_indices = @transform_0, window_bounds = array<i64: 8, 16>}, {transform_indices = @transform_1, window_bounds = array<i64: 16, 32>}, {pipeline_mode = #tpu.pipeline_mode<synchronous>, transform_indices = @transform_2, window_bounds = array<i64: 32, 16>}, {pipeline_mode = #tpu.pipeline_mode<synchronous>, transform_indices = @transform_3, window_bounds = array<i64: 1, 16>}, {transform_indices = @transform_4, window_bounds = array<i64: 8, 16>}]} {
    %c0_i32 = arith.constant 0 : i32
    %0 = arith.cmpi eq, %arg1, %c0_i32 : i32
    %1 = arith.extui %0 : i1 to i32
    %c0_i32_0 = arith.constant 0 : i32
    %2 = arith.cmpi ne, %1, %c0_i32_0 : i32
    scf.if %2 {
      %cst_13 = arith.constant 0.000000e+00 : f32
      %15 = vector.broadcast %cst_13 : f32 to vector<8x16xf32>
      %c0_14 = arith.constant 0 : index
      %c0_15 = arith.constant 0 : index
      %16 = vector.load %arg7[%c0_14, %c0_15] : memref<8x16xf32, #tpu.memory_space<vmem>>, vector<8x16xf32>
      tpu.vector_store %arg7[%c0_14, %c0_15], %15 {strides = array<i32>} : memref<8x16xf32, #tpu.memory_space<vmem>>, vector<8x16xf32>,
    } else {
    }
    %c0 = arith.constant 0 : index
    %c0_1 = arith.constant 0 : index
    %3 = vector.load %arg3[%c0, %c0_1] : memref<16x32xbf16, #tpu.memory_space<vmem>>, vector<16x32xbf16>
    %c0_2 = arith.constant 0 : index
    %c0_3 = arith.constant 0 : index
    %4 = vector.load %arg4[%c0_2, %c0_3] : memref<32x16xbf16, #tpu.memory_space<vmem>>, vector<32x16xbf16>
    %cst = arith.constant dense<0.000000e+00> : vector<16x16xf32>
    %5 = tpu.matmul %3, %4, %cst {dimension_numbers = #tpu.dot_dimension_numbers<[1], [0], [0], [1], [0, 0, 1, 1], [], []>} : vector<16x32xbf16>, vector<32x16xbf16>, vector<16x16xf32> -> vector<16x16xf32>
    %c0_4 = arith.constant 0 : index
    %c0_5 = arith.constant 0 : index
    %6 = vector.load %arg7[%c0_4, %c0_5] : memref<8x16xf32, #tpu.memory_space<vmem>>, vector<8x16xf32>
    %c0_6 = arith.constant 0 : index
    %c0_7 = arith.constant 0 : index
    %7 = vector.load %arg2[%c0_6, %c0_7] : memref<8x16xbf16, #tpu.memory_space<vmem>>, vector<8x16xbf16>
    %8 = arith.truncf %5 : vector<16x16xf32> to vector<16x16xbf16>
    %cst_8 = arith.constant dense<0.000000e+00> : vector<8x16xf32>
    %9 = tpu.matmul %7, %8, %cst_8 {dimension_numbers = #tpu.dot_dimension_numbers<[1], [0], [0], [1], [0, 0, 1, 1], [], []>} : vector<8x16xbf16>, vector<16x16xbf16>, vector<8x16xf32> -> vector<8x16xf32>
    %10 = arith.addf %6, %9 : vector<8x16xf32>
    %c0_9 = arith.constant 0 : index
    %c0_10 = arith.constant 0 : index
    %11 = vector.load %arg7[%c0_9, %c0_10] : memref<8x16xf32, #tpu.memory_space<vmem>>, vector<8x16xf32>
    tpu.vector_store %arg7[%c0_9, %c0_10], %10 {strides = array<i32>} : memref<8x16xf32, #tpu.memory_space<vmem>>, vector<8x16xf32>,
    %c0_i32_11 = arith.constant 0 : i32
    %12 = arith.cmpi eq, %arg1, %c0_i32_11 : i32
    %13 = arith.extui %12 : i1 to i32
    %c0_i32_12 = arith.constant 0 : i32
    %14 = arith.cmpi ne, %13, %c0_i32_12 : i32
    scf.if %14 {
      %c0_13 = arith.constant 0 : index
      %c0_14 = arith.constant 0 : index
      %15 = vector.load %arg7[%c0_13, %c0_14] : memref<8x16xf32, #tpu.memory_space<vmem>>, vector<8x16xf32>
      %c0_15 = arith.constant 0 : index
      %c0_16 = arith.constant 0 : index
      %16 = vector.load %arg5[%c0_15, %c0_16] : memref<1x16xf32, #tpu.memory_space<vmem>>, vector<1x16xf32>
      %17 = vector.broadcast %16 : vector<1x16xf32> to vector<8x16xf32>
      %18 = arith.addf %15, %17 : vector<8x16xf32>
      %c0_17 = arith.constant 0 : index
      %c0_18 = arith.constant 0 : index
      %19 = vector.load %arg6[%c0_17, %c0_18] : memref<8x16xf32, #tpu.memory_space<vmem>>, vector<8x16xf32>
      tpu.vector_store %arg6[%c0_17, %c0_18], %18 {strides = array<i32>} : memref<8x16xf32, #tpu.memory_space<vmem>>, vector<8x16xf32>,
    } else {
    }
    return
  }
  func.func @transform_0(%arg0: i32, %arg1: i32) -> (i32, i32) {
    %c0_i32 = arith.constant 0 : i32
    return %arg0, %arg1 : i32, i32
  }
  func.func @transform_1(%arg0: i32, %arg1: i32) -> (i32, i32) {
    %c0_i32 = arith.constant 0 : i32
    %c0_i32_0 = arith.constant 0 : i32
    return %arg1, %c0_i32 : i32, i32
  }
  func.func @transform_2(%arg0: i32, %arg1: i32) -> (i32, i32) {
    %c0_i32 = arith.constant 0 : i32
    %c0_i32_0 = arith.constant 0 : i32
    %c0_i32_1 = arith.constant 0 : i32
    return %c0_i32, %c0_i32_0 : i32, i32
  }
  func.func @transform_3(%arg0: i32, %arg1: i32) -> (i32, i32) {
    %c0_i32 = arith.constant 0 : i32
    %c0_i32_0 = arith.constant 0 : i32
    %c0_i32_1 = arith.constant 0 : i32
    return %c0_i32, %c0_i32_0 : i32, i32
  }
  func.func @transform_4(%arg0: i32, %arg1: i32) -> (i32, i32) {
    %c0_i32 = arith.constant 0 : i32
    %c0_i32_0 = arith.constant 0 : i32
    return %arg0, %c0_i32 : i32, i32
  }
}

</mosaic_0001>

<bundles_post_ra>
// kernel: gcn_feat_forward.2
= control target key start
LH: loop header
LB: loop body
LE: loop exit
PB: predicated region body
PF: predicated region fallthrough
CT: control target
= control target key end

     0   :  { %s556_s15 = smov 0   ;;  %s558_s16 = smov 0   ;;  %s600_s0 = inlined_call_operand.vmem [shape: bf16[16,16], index: 0, kind: input, shape index: {}]   ;;  %s601_s1 = inlined_call_operand.vmem [shape: bf16[16,8], index: 1, kind: input, shape index: {}]   ;;  %s602_s2 = inlined_call_operand.vmem [shape: bf16[8,32], index: 2, kind: input, shape index: {}]   ;;  %s603_s3 = inlined_call_operand.vmem [shape: f32[1,32], index: 3, kind: input, shape index: {}]   ;;  %s604_s4 = inlined_call_operand.vmem [shape: bf16[16,32], index: 4, kind: output, shape index: {}]  }
   0x1   :  { %s560_s17 = smov 0  }
   0x2 LB: > { %s26_s18 = sadd.s32 1, %s523_s16  ;;  %p453_p0 = scmp.ge.s32.totalorder %s527_s17, 1  ;;  %s527_s17 = sphi %s560_s17, %s14_s17   ;;  %s523_s16 = sphi %s558_s16, %s606_s16   ;;  %s519_s15 = sphi %s556_s15, %s605_s15  }
   0x3   : > { %p28_p1 = scmp.ge.s32.totalorder %s26_s18, 2  ;;  %p189_p2 = scmp.lt.s32.totalorder %s527_s17, 3 }
   0x5   : > { %s608_s18 = smov (%p28_p1, %s26_s18), 0  ;;  %p190_p3 = pnand %p453_p0, %p189_p2 }
   0x6   : > { %v247_v0 = vld [vmem:[%s602_s2] sm:$0xf] (!%p190_p3)  ;;  %vm257_vm0 = vcmask (!%p190_p3), 1043456   ;;  %v529_v1 = vmov (!%p190_p3), 0.0   ;;  %vm530_vm1 = vmmov (!%p190_p3), 0   ;;  %vm253_vm2 = vcmask (!%p190_p3), 64512  }
   0x7   : > { %193 = sbr.rel (%p190_p3) target bundleno = 459 (0x1cb), region = 36  ;;  %466 = vmatprep.subr.bf16.mxu0 (!%p190_p3), %v529_v1  ;;  %v259_v2 = vsel (!%p190_p3), %vm257_vm0, %v247_v0, 0  ;;  %468 = vmatprep.mubr.msk.bf16.mxu0 (!%p190_p3), %vm530_vm1, %v529_v1  ;;  %v504_v3 = vld [vmem:[%s601_s1] sm:$0xff] (!%p190_p3)   ;;  %vm243_vm3 = vcmask (!%p190_p3), 261120   ;;  %p221_p4 = scmp.lt.s32.totalorder (!%p190_p3), %s519_s15, 1  ;;  %vm305_vm4 = vcmask (!%p190_p3), 130048  }
   0x8   : > { %467 = vmatpush3.bf16.msra.mxu0 (!%p190_p3), %v259_v2  ;;  %472 = vmatprep.subr.bf16.mxu1 (!%p190_p3), %v529_v1  ;;  %244 = vst.msk [vmem:[#allocation2] sm:$0xff] (!%p190_p3), %vm243_vm3, %v529_v1  ;;  %v459_v16 = vld [vmem:[%s603_s3] ss:$0 sm:$0xff] (!%p190_p3)  ;;  %vm366_vm5 = vcmask (!%p190_p3), 257024  }
   0x9   : > { %474 = vmatprep.mubr.msk.bf16.mxu1 (!%p190_p3), %vm530_vm1, %v529_v1 }
   0xb   : > { %469 = vmatmul.mubr.msk.bf16.vlgmr.msra.gmra.mrb[0].mxu0 (!%p190_p3), %vm253_vm2, %v504_v3 }
   0xe   : > { %s610_s15 = smov (!%p221_p4, %s519_s15), 1 }
   0xf   : > { %s454_s23 = sshll.u32 %s610_s15, 2  ;;  %v302_v10 = vld [vmem:[#allocation2] sm:$0xff] }
  0x10   : > { %s227_s26 = scalar_lea.vmem %s600_s0, %s454_s23  ;;  %s237_s5 = scalar_lea.vmem %s604_s4, %s454_s23 }
  0x11   : > { %v303_v9 = vld [vmem:[%s227_s26] sm:$0xf] }
  0xde   : > { %v295_v4 = vpop.f32.mrb[0].mxu0 }
  0xdf   : > { %v470_v5 = vpop.f32.mrb[1].mxu0 }
  0xe0   : > { %v298_v6 = vpop.f32.mrb[2].mxu0 }
  0xe1   : > { %v304_v7 = vpack.c.bf16 %v298_v6, %v295_v4  ;;  %v471_v8 = vpop.f32.mrb[3].mxu0 }
  0xe3   : > { %473 = vmatpush3.bf16.msra.mxu1 %v304_v7 }
  0xe6   : > { %475 = vmatmul.mubr.msk.bf16.vlgmr.msra.gmra.mrb[0].mxu1 %vm305_vm4, %v303_v9 }
 0x1b9   : > { %v343_v11 = vpop.f32.mrb[0].mxu1 }
 0x1ba   : > { %v349_v12 = vadd.f32 %v343_v11, %v302_v10  ;;  %v476_v13 = vpop.f32.mrb[1].mxu1 }
 0x1bb   : > { %v346_v14 = vpop.f32.mrb[2].mxu1 }
 0x1bc   : > { %351 = vst.msk [vmem:[#allocation2] sm:$0xff] %vm243_vm3, %v349_v12  ;;  %v477_v15 = vpop.f32.mrb[3].mxu1 }
 0x1c3   : > { %v355_v17 = vld [vmem:[#allocation2] sm:$0xff] }
 0x1c4   : > { %v363_v18 = vadd.f32 %v459_v16, %v355_v17 }
 0x1c6   : > { %v364_v19 = vmax.f32 %v363_v18, 0.0 }
 0x1c8   : > { %v365_v20 = vpack.c.bf16 %v364_v19, %v364_v19 }
 0x1ca   : > { %367 = vst.msk [vmem:[%s237_s5] sm:$0xf] %vm366_vm5, %v365_v20 }
 0x1cb PF: > { %s14_s17 = sadd.s32 1, %s527_s17   ;;  %s605_s15 = smov %s523_s16 }
 0x1cc   : > { %p11_p5 = scmp.ge.s32.totalorder %s14_s17, 4   ;;  %s606_s16 = smov %s608_s18 }
 0x1ce   :  { %13 = sbr.rel (!%p11_p5) target bundleno = 2 (0x2), region = 77 }

// kernel: gcn_feat_forward.3
= control target key start
LH: loop header
LB: loop body
LE: loop exit
PB: predicated region body
PF: predicated region fallthrough
CT: control target
= control target key end

     0   :  { %9 = vsyncpa [#allocation4], 0  ;;  %s807_s0 = inlined_call_operand.vmem [shape: bf16[16,16], index: 0, kind: input, shape index: {}]   ;;  %s808_s1 = inlined_call_operand.vmem [shape: bf16[16,32], index: 1, kind: input, shape index: {}]   ;;  %s809_s2 = inlined_call_operand.vmem [shape: bf16[32,16], index: 2, kind: input, shape index: {}]   ;;  %s810_s3 = inlined_call_operand.vmem [shape: f32[1,16], index: 3, kind: input, shape index: {}]   ;;  %s811_s4 = inlined_call_operand.hbm [shape: f32[16,16], index: 4, kind: output, shape index: {}]  }
   0x1   :  { %11 = vsyncpa [#allocation4 + $0x1], 0  ;;  %s679_s15 = smov 0   ;;  %s681_s16 = smov 0  }
   0x2   :  { %s683_s17 = smov 0   ;;  %s685_s18 = smov 0  }
   0x3   :  { %s687_s19 = smov 0   ;;  %s689_s20 = smov 0  }
   0x4 LB: > { %s474_s21 = sadd.s32 4294967295, %s649_s20   ;;  %s475_s22 = sadd.s32 4294967294, %s649_s20   ;;  %s649_s20 = sphi %s689_s20, %s17_s20   ;;  %s645_s19 = sphi %s687_s19, %s818_s19   ;;  %s641_s18 = sphi %s685_s18, %s817_s18   ;;  %s637_s17 = sphi %s683_s17, %s816_s17   ;;  %s633_s16 = sphi %s681_s16, %s815_s16   ;;  %s629_s15 = sphi %s679_s15, %s814_s15  }
   0x5   : > { %s29_s23 = sadd.s32 1, %s645_s19  ;;  %s132_s24 = sadd.s32 1, %s637_s17 }
   0x6   : > { %p31_p0 = scmp.ge.s32.totalorder %s29_s23, 2  ;;  %p142_p1 = scmp.ne.s32.totalorder %s637_s17, %s633_s16 }
   0x7   : > { %p143_p2 = scmp.eq.s32.totalorder %s474_s21, 1  ;;  %p148_p3 = scmp.ne.s32.totalorder %s633_s16, %s629_s15 }
   0x8   : > { %s820_s23 = smov (%p31_p0, %s29_s23), 0  ;;  %p149_p5 = scmp.eq.s32.totalorder %s475_s22, 1 }
   0x9   : > { %p719_p4 = por %p143_p2, %p142_p1  ;;  %s129_s26 = ssub.s32 %s645_s19, %s820_s23 }
   0xa   : > { %p479_p6 = scmp.ge.s32.totalorder %s649_s20, 1  ;;  %p130_p7 = scmp.eq.s32.totalorder %s129_s26, 0 }
   0xb   : > { %p726_p8 = por %p149_p5, %p148_p3  ;;  %p192_p9 = scmp.lt.s32.totalorder %s649_s20, 3 }
   0xc   : > { %s732_s28 = scalar_select %p130_p7, %s637_s17, %s132_s24  }
   0xd   : > { %p193_p10 = pnand %p479_p6, %p192_p9 }
   0xe   : > { %v568_v0 = vld [vmem:[%s809_s2] sm:$0xff] (!%p193_p10)   ;;  %v651_v1 = vmov (!%p193_p10), 0.0   ;;  %v569_v2 = vld [vmem:[%s809_s2 + $0x8] sm:$0xff] (!%p193_p10)   ;;  %vm652_vm0 = vmmov (!%p193_p10), 0   ;;  %vm268_vm1 = vcmask (!%p193_p10), 261120   ;;  %vm243_vm2 = vcmask (!%p193_p10), 130048  }
   0xf   : > { %196 = sbr.rel (%p193_p10) target bundleno = 480 (0x1e0), region = 36  ;;  %497 = vmatprep.subr.bf16.mxu0 (!%p193_p10), %v651_v1  ;;  %505 = vmatprep.subr.bf16.mxu1 (!%p193_p10), %v651_v1  ;;  %v570_v3 = vld [vmem:[%s808_s1] sm:$0xff] (!%p193_p10)   ;;  %244 = vst.msk [vmem:[#allocation2] sm:$0xff] (!%p193_p10), %vm243_vm2, %v651_v1  ;;  %p225_p11 = scmp.lt.s32.totalorder (!%p193_p10), %s641_s18, 1 }
  0x10   : > { %498 = vmatpush3.bf16.msra.mxu0 (!%p193_p10), %v568_v0  ;;  %501 = vmatprep.mubr.msk.bf16.mxu0 (!%p193_p10), %vm652_vm0, %v651_v1  ;;  %s222_s14 = sand.u32 (!%p193_p10), 1, %s633_s16   ;;  %v487_v16 = vld [vmem:[%s810_s3] ss:$0 sm:$0xff] (!%p193_p10)  ;;  %s489_s26 = sshll.u32 (!%p193_p10), %s641_s18, 7 }
  0x11   : > { %499 = vmatprep.subr.bf16.mxu0 (!%p193_p10), %v651_v1  ;;  %507 = vmatprep.mubr.msk.bf16.mxu1 (!%p193_p10), %vm652_vm0, %v651_v1  ;;  %s480_s21 = sshll.u32 (!%p193_p10), %s222_s14, 3  ;;  %s759_s7 = scalar_lea.hbm (!%p193_p10), %s811_s4, %s489_s26 }
  0x12   : > { %s224_s29 = scalar_lea.vmem (!%p193_p10), [#allocation3], %s480_s21  ;;  %s376_s8 = scalar_lea.sflag (!%p193_p10), [#allocation4], %s222_s14 }
  0x13   : > { %s389_s30 = sshll.u32 (!%p193_p10), %s224_s29, 4  ;;  %s761_s30 = int_to_ptr.vmem [resolvable:$true] %s389_s30 }
  0x14   : > { %500 = vmatpush3.bf16.msra.mxu0 (!%p193_p10), %v569_v2 }
  0x16   : > { %s226_s9 = scalar_select %p225_p11, %s641_s18, 1  ;;  %v313_v10 = vld [vmem:[#allocation2] sm:$0xff] }
  0x17   : > { %502 = vmatmul.mubr.msk.bf16.vlgmr.msra.gmra.mrb[0].mxu0 %vm268_vm1, %v570_v3  ;;  %s653_s18 = smov [#allocation3]  }
  0x18   : > { %s481_s10 = sshll.u32 %s226_s9, 2  ;;  %s571_s9 = scalar_lea.vmem %s761_s30, 128 }
  0x19   : > { %s231_s13 = scalar_lea.vmem %s807_s0, %s481_s10  ;;  %p572_p12 = scmp.ne.s32.totalorder %s761_s30, %s571_s9 }
  0x1a   : > { %v314_v9 = vld [vmem:[%s231_s13] sm:$0xf]  ;;  %s575_s10 = sshll.u32 %s653_s18, 4  ;;  %s576_s10 = int_to_ptr.vmem [resolvable:$false] %s575_s10 }
  0x1b   : > { %p573_p13 = pnand %p572_p12, %p719_p4  ;;  %s577_s11 = scalar_lea.vmem %s576_s10, 256 }
  0x1c   : > { %p578_p1 = scmp.lt.s32.totalorder %s761_s30, %s576_s10  ;;  %p579_p2 = scmp.lt.s32.totalorder %s577_s11, %s571_s9 }
  0x1d   : > { %p574_p0 = pneg %p573_p13 }
  0x1e   : > { %p580_p3 = por %p579_p2, %p578_p1 }
  0x20   : > { %p581_p5 = pnand %p580_p3, %p574_p0 }
  0xea   : > { %v306_v4 = vpop.f32.mrb[0].mxu0 }
  0xeb   : > { %v503_v5 = vpop.f32.mrb[1].mxu0 }
  0xec   : > { %v309_v6 = vpop.f32.mrb[2].mxu0 }
  0xed   : > { %v315_v7 = vpack.c.bf16 %v309_v6, %v306_v4  ;;  %v504_v8 = vpop.f32.mrb[3].mxu0 }
  0xef   : > { %506 = vmatpush3.bf16.msra.mxu1 %v315_v7 }
  0xf2   : > { %508 = vmatmul.mubr.msk.bf16.vlgmr.msra.gmra.mrb[0].mxu1 %vm243_vm2, %v314_v9 }
 0x1c5   : > { %v354_v11 = vpop.f32.mrb[0].mxu1 }
 0x1c6   : > { %v360_v12 = vadd.f32 %v354_v11, %v313_v10  ;;  %v509_v13 = vpop.f32.mrb[1].mxu1 }
 0x1c7   : > { %v357_v14 = vpop.f32.mrb[2].mxu1 }
 0x1c8   : > { %361 = vst.msk [vmem:[#allocation2] sm:$0xff] %vm243_vm2, %v360_v12  ;;  %v510_v15 = vpop.f32.mrb[3].mxu1 }
 0x1cf   : > { %v365_v17 = vld [vmem:[#allocation2] sm:$0xff] }
 0x1d0   : > { %v373_v18 = vadd.f32 %v487_v16, %v365_v17 }
 0x1d2   : > { %374 = vst.msk [vmem:[%s224_s29] sm:$0xff] %vm243_vm2, %v373_v18 }
 0x1d3   : > { %584 = shalt.err (!%p581_p5)
}
 0x1d4   : > { %s585_s12 = scalar_lea.hbm %s759_s7, 128  ;;  %s589_s21 = scalar_lea.hbm %s811_s4, 256 }
 0x1d5   : > { %p586_p6 = scmp.ne.s32.totalorder %s759_s7, %s585_s12  ;;  %p590_p10 = scmp.lt.u32.totalorder %s759_s7, %s811_s4 }
 0x1d6   : > { %p591_p11 = scmp.lt.u32.totalorder %s589_s21, %s585_s12  ;;  %p593_p13 = scmp.lt.u32.totalorder %s585_s12, %s759_s7 }
 0x1d7   : > { %p587_p7 = pnand %p586_p6, %p719_p4 }
 0x1d8   : > { %p592_p12 = por %p591_p11, %p590_p10 }
 0x1d9   : > { %p588_p9 = pneg %p587_p7 }
 0x1da   : > { %p594_p0 = por %p593_p13, %p592_p12 }
 0x1dc   : > { %p595_p1 = pnand %p594_p0, %p588_p9 }
 0x1de   : > { %598 = shalt.err (!%p595_p1)
}
 0x1df   : > { %511 = dma.vmem_to_hbm [thread:$0]  (%p719_p4), %s761_s30, 128, %s759_s7, %s376_s8  }
 0x1e0 PF: > { %p517_p2 = scmp.ge.s32.totalorder %s649_s20, 2  ;;  %s401_s26 = sand.u32 1, %s629_s15  }
 0x1e1   : > { %s402_s29 = scalar_lea.sflag [#allocation4], %s401_s26 }
 0x1e2   : > { %p514_p3 = pnand %p517_p2, %p726_p8 }
 0x1e4   : > { %624 = dma.done.wait (!%p514_p3), %s402_s29, 128  }
 0x1e5   : > { %626 = vsyncadd (!%p514_p3), %s402_s29, 4294967168  ;;  %s17_s20 = sadd.s32 1, %s649_s20   ;;  %s814_s15 = smov %s633_s16 }
 0x1e6   : > { %p14_p5 = scmp.ge.s32.totalorder %s17_s20, 4   ;;  %s815_s16 = smov %s637_s17 }
 0x1e7   : > { %s816_s17 = smov %s732_s28  ;;  %s817_s18 = smov %s645_s19 }
 0x1e8   : > { %s818_s19 = smov %s820_s23  ;;  %16 = sbr.rel (!%p14_p5) target bundleno = 4 (0x4), region = 82 }
 0x1ef   :  { %407 = vsyncpa [#allocation4], 1 }
 0x1f0   :  { %409 = vsyncpa [#allocation4 + $0x1], 1 }

</bundles_post_ra>
